<compile_context>
chip_gen: v5e
topology: v5e:2x2
jax: 0.10.0
libtpu: 0.0.40
codegen_flags: <defaults>
</compile_context>

<pallas_src>
import jax
import jax.numpy as jnp
from jax import lax
from jax.experimental import pallas as pl
from jax.experimental.pallas import tpu as pltpu


# ---------------------------------------------------------------------------
# Pass 1: per-(batch, hw-tile) Gram statistics of the INPUT only.
# ---------------------------------------------------------------------------
def _make_gram_stats_kernel(hw_total, tile_hw, needs_mask):
    def kernel(x_ref, g_ref, s_ref):
        x = x_ref[...]                                        # [Cin, tile_hw]
        if needs_mask:
            # Ragged last tile: zero out-of-range columns so they do not
            # contribute to the statistics (OOB input reads are unspecified).
            col = (lax.broadcasted_iota(jnp.int32, x.shape, 1)
                   + pl.program_id(1) * tile_hw)
            x = jnp.where(col < hw_total, x, jnp.zeros_like(x))
        # Gram matrix X @ X^T, contracting the HW (lane) axis on the MXU.
        g_ref[...] = lax.dot_general(
            x, x, (((1,), (1,)), ((), ())),
            preferred_element_type=jnp.float32)
        # Per-channel column sum (tiny Cin-row reduce).
        s_ref[...] = jnp.sum(x.astype(jnp.float32), axis=1, keepdims=True)

    return kernel


# ---------------------------------------------------------------------------
# Pass 2: Y = (W*scale) @ X, + shift, ReLU, accumulate into the aliased acc.
# ---------------------------------------------------------------------------
def _conv_bn_relu_add_kernel(x_ref, ws_ref, shift_ref, acc_ref, out_ref):
    y = jnp.dot(ws_ref[...], x_ref[...], preferred_element_type=jnp.float32)
    y = jnp.maximum(y + shift_ref[...], 0.0)                 # folded BN + ReLU
    out_ref[...] = (acc_ref[...].astype(jnp.float32) + y).astype(out_ref.dtype)


# ---------------------------------------------------------------------------
# Generation-aware tiling / VMEM budget
# ---------------------------------------------------------------------------
def _vmem_config():
    """Returns (max_tile_hw, vmem_limit_bytes) for the current TPU generation."""
    try:
        cap = int(getattr(pltpu.get_tpu_info(), "vmem_capacity_bytes", 0))
    except Exception:
        cap = 0
    if cap >= 120 * 1024 * 1024:          # v5e / v6e: 128 MiB VMEM per core
        return 8192, 80 * 1024 * 1024     # bigger tiles, longer DMAs
    return 2048, 48 * 1024 * 1024         # v7x (64 MiB per core) / unknown


# ---------------------------------------------------------------------------
# Wrapper (layout plumbing + BN folding)
# ---------------------------------------------------------------------------
def simple_highres_fusion(feat, fused_accumulator, params, *, eps=1e-5):
    B, C, H, W = feat.shape
    Cout = fused_accumulator.shape[1]

    if C == 32:
        w, _b, gamma, beta = params["adapter_32"]
    elif C == 64:
        w, _b, gamma, beta = params["adapter_64"]
    else:
        raise ValueError(f"Unsupported input channels: {C}")

    HW = H * W
    max_tile_hw, vmem_limit = _vmem_config()
    if HW <= max_tile_hw:
        tile_hw = HW                      # full-extent block is always legal
    else:
        tile_hw = max_tile_hw             # multiple of 128; ragged tail is ok
    n_hw = (HW + tile_hw - 1) // tile_hw
    needs_mask = (HW % tile_hw) != 0
    grid = (B, n_hw)

    # Native NCHW: flatten trailing spatial dims (free reshape, no transpose,
    # no dtype copies -- X / acc keep the caller dtypes).
    x = feat.reshape(B, C, HW)
    acc = fused_accumulator.reshape(B, Cout, HW)

    # Conv2d weight [Cout, Cin, 1, 1] -> [Cout, Cin] matmul weight (tiny).
    w2 = w.reshape(Cout, C).astype(jnp.float32)

    # ---------------- pass 1: Gram statistics of the input ----------------
    gpart, spart = pl.pallas_call(
        _make_gram_stats_kernel(HW, tile_hw, needs_mask),
        out_shape=(
            jax.ShapeDtypeStruct((B, n_hw, C, C), jnp.float32),
            jax.ShapeDtypeStruct((B, n_hw, C, 1), jnp.float32),
        ),
        grid_spec=pltpu.PrefetchScalarGridSpec(
            num_scalar_prefetch=0,
            grid=grid,
            in_specs=[
                pl.BlockSpec((None, C, tile_hw), lambda b, j: (b, 0, j)),
            ],
            out_specs=[
                pl.BlockSpec((None, None, C, C), lambda b, j: (b, j, 0, 0)),
                pl.BlockSpec((None, None, C, 1), lambda b, j: (b, j, 0, 0)),
            ],
        ),
        compiler_params=pltpu.CompilerParams(
            dimension_semantics=("parallel", "parallel"),
            vmem_limit_bytes=vmem_limit),
    )(x)

    # Tiny cross-(batch, tile) reduction + BN folding (negligible XLA work).
    n_total = float(B * HW)
    g_total = jnp.sum(gpart, axis=(0, 1))                     # [Cin, Cin]
    xs_total = jnp.sum(spart, axis=(0, 1))                    # [Cin, 1]
    mean = (w2 @ xs_total) / n_total                          # [Cout, 1]
    ey2 = jnp.sum((w2 @ g_total) * w2, axis=1, keepdims=True) / n_total
    # E[y^2] - mean^2 can go slightly negative from f32 cancellation; clamp.
    var = jnp.maximum(ey2 - mean * mean, 0.0)                 # biased variance
    scale = gamma.reshape(Cout, 1).astype(jnp.float32) * lax.rsqrt(var + eps)
    shift = beta.reshape(Cout, 1).astype(jnp.float32) - mean * scale
    # Fold the BN scale into the matmul weight (tiny [Cout, Cin] op) and match
    # the activation dtype so the MXU gets its native fast path.
    ws = (w2 * scale).astype(x.dtype)

    # ---------------- pass 2: conv + BN + ReLU + accumulate ----------------
    out = pl.pallas_call(
        _conv_bn_relu_add_kernel,
        out_shape=jax.ShapeDtypeStruct((B, Cout, HW), acc.dtype),
        grid_spec=pltpu.PrefetchScalarGridSpec(
            num_scalar_prefetch=0,
            grid=grid,
            in_specs=[
                pl.BlockSpec((None, C, tile_hw), lambda b, j: (b, 0, j)),
                pl.BlockSpec((Cout, C), lambda b, j: (0, 0)),
                pl.BlockSpec((Cout, 1), lambda b, j: (0, 0)),
                pl.BlockSpec((None, Cout, tile_hw), lambda b, j: (b, 0, j)),
            ],
            out_specs=pl.BlockSpec((None, Cout, tile_hw),
                                   lambda b, j: (b, 0, j)),
        ),
        compiler_params=pltpu.CompilerParams(
            dimension_semantics=("parallel", "parallel"),
            vmem_limit_bytes=vmem_limit),
        input_output_aliases={3: 0},      # update accumulator in place
    )(x, ws, shift, acc)

    return out.reshape(B, Cout, H, W)


# ---------------------------------------------------------------------------
# Deterministic parameter init (nn.Conv2d-style bounds; fresh BatchNorm:
# gamma=1, beta=0).  The conv bias is kept for module fidelity but is a no-op
# through training-mode BatchNorm, so the kernels drop it.
# ---------------------------------------------------------------------------
def init_params(key, out_channels=256):
    def adapter(k, cin):
        kw, kb = jax.random.split(k)
        bound = 1.0 / jnp.sqrt(float(cin))
        w = jax.random.uniform(kw, (out_channels, cin, 1, 1), jnp.float32,
                               -bound, bound)
        b = jax.random.uniform(kb, (out_channels,), jnp.float32, -bound, bound)
        gamma = jnp.ones((out_channels,), jnp.float32)
        beta = jnp.zeros((out_channels,), jnp.float32)
        return (w, b, gamma, beta)

    k32, k64 = jax.random.split(key)
    return {"adapter_32": adapter(k32, 32), "adapter_64": adapter(k64, 64)}


# ---------------------------------------------------------------------------
# Pure-JAX reference (mirrors the PyTorch module semantics exactly,
# including the conv bias and training-mode batch statistics).
# ---------------------------------------------------------------------------
def reference(feat, fused_accumulator, params, eps=1e-5):
    C = feat.shape[1]
    w, b, gamma, beta = params["adapter_32" if C == 32 else "adapter_64"]
    y = jax.lax.conv_general_dilated(
        feat, w, window_strides=(1, 1), padding="VALID",
        dimension_numbers=("NCHW", "OIHW", "NCHW"))
    y = y + b.reshape(1, -1, 1, 1)
    mean = jnp.mean(y, axis=(0, 2, 3), keepdims=True)
    var = jnp.mean((y - mean) ** 2, axis=(0, 2, 3), keepdims=True)
    yn = (y - mean) * jax.lax.rsqrt(var + eps)
    yn = yn * gamma.reshape(1, -1, 1, 1) + beta.reshape(1, -1, 1, 1)
    return fused_accumulator + jnp.maximum(yn, 0.0)


if __name__ == "__main__":
    key = jax.random.PRNGKey(0)
    kp, k1, k2, k3 = jax.random.split(key, 4)
    params = init_params(kp, out_channels=256)

    B, H, W, Cout = 2, 16, 16, 256

    # Donate the accumulator so the in-kernel aliasing becomes an end-to-end
    # in-place update (no defensive copy of the accumulator stream).
    fusion = jax.jit(simple_highres_fusion, donate_argnums=(1,))

    for cin, kf in ((32, k1), (64, k2)):
        feat = jax.random.normal(kf, (B, cin, H, W), jnp.float32)
        fused_acc = jax.random.normal(k3, (B, Cout, H, W), jnp.float32)
        ref = reference(feat, fused_acc, params)   # before fused_acc is donated
        out = fusion(feat, fused_acc, params)
        out = jax.block_until_ready(out)
        assert out.shape == (B, Cout, H, W)
        assert out.dtype == jnp.float32
        err = float(jnp.max(jnp.abs(out - ref)))
        assert jnp.allclose(out, ref, rtol=1e-4, atol=1e-4), err

    print("KERNEL_OK")
</pallas_src>

<mosaic_0001>
module attributes {stable_mosaic.version = 11 : i64} {
  func.func @kernel(%arg0: i32, %arg1: i32, %arg2: memref<1x32x256xf32, #tpu.memory_space<vmem>>, %arg3: memref<1x1x32x32xf32, #tpu.memory_space<vmem>>, %arg4: memref<1x1x32x1xf32, #tpu.memory_space<vmem>>) attributes {dimension_semantics = [#tpu.dimension_semantics<parallel>, #tpu.dimension_semantics<parallel>], iteration_bounds = array<i64: 2, 1>, scalar_prefetch = 0 : i64, scratch_operands = 0 : i64, tpu.core_type = #tpu.core_type<tc>, window_params = [{transform_indices = @transform_0, window_bounds = array<i64: 1, 32, 256>}, {transform_indices = @transform_1, window_bounds = array<i64: 1, 1, 32, 32>}, {transform_indices = @transform_2, window_bounds = array<i64: 1, 1, 32, 1>}]} {
    %c0 = arith.constant 0 : index
    %c0_0 = arith.constant 0 : index
    %c0_1 = arith.constant 0 : index
    %0 = vector.load %arg2[%c0, %c0_0, %c0_1] : memref<1x32x256xf32, #tpu.memory_space<vmem>>, vector<1x32x256xf32>
    %1 = vector.shape_cast %0 : vector<1x32x256xf32> to vector<32x256xf32>
    %cst = arith.constant dense<0.000000e+00> : vector<32x32xf32>
    %2 = tpu.matmul %1, %1, %cst {dimension_numbers = #tpu.dot_dimension_numbers<[1], [1], [0], [0], [0, 0, 1, 0], [], []>} : vector<32x256xf32>, vector<32x256xf32>, vector<32x32xf32> -> vector<32x32xf32>
    %c0_2 = arith.constant 0 : index
    %c0_3 = arith.constant 0 : index
    %c0_4 = arith.constant 0 : index
    %c0_5 = arith.constant 0 : index
    %3 = vector.load %arg3[%c0_2, %c0_3, %c0_4, %c0_5] : memref<1x1x32x32xf32, #tpu.memory_space<vmem>>, vector<1x1x32x32xf32>
    %4 = vector.shape_cast %3 : vector<1x1x32x32xf32> to vector<32x32xf32>
    %5 = vector.shape_cast %2 : vector<32x32xf32> to vector<1x1x32x32xf32>
    tpu.vector_store %arg3[%c0_2, %c0_3, %c0_4, %c0_5], %5 {strides = array<i32>} : memref<1x1x32x32xf32, #tpu.memory_space<vmem>>, vector<1x1x32x32xf32>,
    %cst_6 = arith.constant dense<0.000000e+00> : vector<32xf32>
    %6 = vector.multi_reduction <add>, %1, %cst_6 [1] : vector<32x256xf32> to vector<32xf32>
    %7 = vector.shape_cast %6 : vector<32xf32> to vector<32x1xf32>
    %c0_7 = arith.constant 0 : index
    %c0_8 = arith.constant 0 : index
    %c0_9 = arith.constant 0 : index
    %c0_10 = arith.constant 0 : index
    %8 = vector.load %arg4[%c0_7, %c0_8, %c0_9, %c0_10] : memref<1x1x32x1xf32, #tpu.memory_space<vmem>>, vector<1x1x32x1xf32>
    %9 = vector.shape_cast %8 : vector<1x1x32x1xf32> to vector<32x1xf32>
    %10 = vector.shape_cast %7 : vector<32x1xf32> to vector<1x1x32x1xf32>
    tpu.vector_store %arg4[%c0_7, %c0_8, %c0_9, %c0_10], %10 {strides = array<i32>} : memref<1x1x32x1xf32, #tpu.memory_space<vmem>>, vector<1x1x32x1xf32>,
    return
  }
  func.func @transform_0(%arg0: i32, %arg1: i32) -> (i32, i32, i32) {
    %c0_i32 = arith.constant 0 : i32
    %c0_i32_0 = arith.constant 0 : i32
    return %arg0, %c0_i32, %arg1 : i32, i32, i32
  }
  func.func @transform_1(%arg0: i32, %arg1: i32) -> (i32, i32, i32, i32) {
    %c0_i32 = arith.constant 0 : i32
    %c0_i32_0 = arith.constant 0 : i32
    %c0_i32_1 = arith.constant 0 : i32
    return %arg0, %arg1, %c0_i32, %c0_i32_0 : i32, i32, i32, i32
  }
  func.func @transform_2(%arg0: i32, %arg1: i32) -> (i32, i32, i32, i32) {
    %c0_i32 = arith.constant 0 : i32
    %c0_i32_0 = arith.constant 0 : i32
    %c0_i32_1 = arith.constant 0 : i32
    return %arg0, %arg1, %c0_i32, %c0_i32_0 : i32, i32, i32, i32
  }
}

module attributes {stable_mosaic.version = 11 : i64} {
  func.func @_conv_bn_relu_add_kernel(%arg0: i32, %arg1: i32, %arg2: memref<1x32x256xf32, #tpu.memory_space<vmem>>, %arg3: memref<256x32xf32, #tpu.memory_space<vmem>>, %arg4: memref<256x1xf32, #tpu.memory_space<vmem>>, %arg5: memref<1x256x256xf32, #tpu.memory_space<vmem>>, %arg6: memref<1x256x256xf32, #tpu.memory_space<vmem>>) attributes {dimension_semantics = [#tpu.dimension_semantics<parallel>, #tpu.dimension_semantics<parallel>], iteration_bounds = array<i64: 2, 1>, scalar_prefetch = 0 : i64, scratch_operands = 0 : i64, tpu.core_type = #tpu.core_type<tc>, window_params = [{transform_indices = @transform_0, window_bounds = array<i64: 1, 32, 256>}, {pipeline_mode = #tpu.pipeline_mode<synchronous>, transform_indices = @transform_1, window_bounds = array<i64: 256, 32>}, {pipeline_mode = #tpu.pipeline_mode<synchronous>, transform_indices = @transform_2, window_bounds = array<i64: 256, 1>}, {transform_indices = @transform_3, window_bounds = array<i64: 1, 256, 256>}, {transform_indices = @transform_4, window_bounds = array<i64: 1, 256, 256>}]} {
    %c0 = arith.constant 0 : index
    %c0_0 = arith.constant 0 : index
    %0 = vector.load %arg3[%c0, %c0_0] : memref<256x32xf32, #tpu.memory_space<vmem>>, vector<256x32xf32>
    %c0_1 = arith.constant 0 : index
    %c0_2 = arith.constant 0 : index
    %c0_3 = arith.constant 0 : index
    %1 = vector.load %arg2[%c0_1, %c0_2, %c0_3] : memref<1x32x256xf32, #tpu.memory_space<vmem>>, vector<1x32x256xf32>
    %2 = vector.shape_cast %1 : vector<1x32x256xf32> to vector<32x256xf32>
    %cst = arith.constant dense<0.000000e+00> : vector<256x256xf32>
    %3 = tpu.matmul %0, %2, %cst {dimension_numbers = #tpu.dot_dimension_numbers<[1], [0], [0], [1], [0, 0, 1, 1], [], []>} : vector<256x32xf32>, vector<32x256xf32>, vector<256x256xf32> -> vector<256x256xf32>
    %c0_4 = arith.constant 0 : index
    %c0_5 = arith.constant 0 : index
    %4 = vector.load %arg4[%c0_4, %c0_5] : memref<256x1xf32, #tpu.memory_space<vmem>>, vector<256x1xf32>
    %5 = vector.broadcast %4 : vector<256x1xf32> to vector<256x256xf32>
    %6 = arith.addf %3, %5 : vector<256x256xf32>
    %cst_6 = arith.constant 0.000000e+00 : f32
    %7 = vector.broadcast %cst_6 : f32 to vector<256x256xf32>
    %8 = arith.maximumf %6, %7 : vector<256x256xf32>
    %c0_7 = arith.constant 0 : index
    %c0_8 = arith.constant 0 : index
    %c0_9 = arith.constant 0 : index
    %9 = vector.load %arg5[%c0_7, %c0_8, %c0_9] : memref<1x256x256xf32, #tpu.memory_space<vmem>>, vector<1x256x256xf32>
    %10 = vector.shape_cast %9 : vector<1x256x256xf32> to vector<256x256xf32>
    %11 = arith.addf %10, %8 : vector<256x256xf32>
    %c0_10 = arith.constant 0 : index
    %c0_11 = arith.constant 0 : index
    %c0_12 = arith.constant 0 : index
    %12 = vector.load %arg6[%c0_10, %c0_11, %c0_12] : memref<1x256x256xf32, #tpu.memory_space<vmem>>, vector<1x256x256xf32>
    %13 = vector.shape_cast %12 : vector<1x256x256xf32> to vector<256x256xf32>
    %14 = vector.shape_cast %11 : vector<256x256xf32> to vector<1x256x256xf32>
    tpu.vector_store %arg6[%c0_10, %c0_11, %c0_12], %14 {strides = array<i32>} : memref<1x256x256xf32, #tpu.memory_space<vmem>>, vector<1x256x256xf32>,
    return
  }
  func.func @transform_0(%arg0: i32, %arg1: i32) -> (i32, i32, i32) {
    %c0_i32 = arith.constant 0 : i32
    %c0_i32_0 = arith.constant 0 : i32
    return %arg0, %c0_i32, %arg1 : i32, i32, i32
  }
  func.func @transform_1(%arg0: i32, %arg1: i32) -> (i32, i32) {
    %c0_i32 = arith.constant 0 : i32
    %c0_i32_0 = arith.constant 0 : i32
    %c0_i32_1 = arith.constant 0 : i32
    return %c0_i32, %c0_i32_0 : i32, i32
  }
  func.func @transform_2(%arg0: i32, %arg1: i32) -> (i32, i32) {
    %c0_i32 = arith.constant 0 : i32
    %c0_i32_0 = arith.constant 0 : i32
    %c0_i32_1 = arith.constant 0 : i32
    return %c0_i32, %c0_i32_0 : i32, i32
  }
  func.func @transform_3(%arg0: i32, %arg1: i32) -> (i32, i32, i32) {
    %c0_i32 = arith.constant 0 : i32
    %c0_i32_0 = arith.constant 0 : i32
    return %arg0, %c0_i32, %arg1 : i32, i32, i32
  }
  func.func @transform_4(%arg0: i32, %arg1: i32) -> (i32, i32, i32) {
    %c0_i32 = arith.constant 0 : i32
    %c0_i32_0 = arith.constant 0 : i32
    return %arg0, %c0_i32, %arg1 : i32, i32, i32
  }
}

</mosaic_0001>

<bundles_post_ra>
// kernel: mul.9
= control target key start
LH: loop header
LB: loop body
LE: loop exit
PB: predicated region body
PF: predicated region fallthrough
CT: control target
= control target key end

     0   :  { %s56_s0 = inlined_call_operand.vmem [shape: f32[256,1], index: 0, kind: input, shape index: {}, may-alias: {0,1}]   ;;  %s57_s1 = inlined_call_operand.vmem [shape: f32[256,1], index: 1, kind: input, shape index: {}, may-alias: {0,1}]   ;;  %s58_s2 = inlined_call_operand.vmem [shape: f32[256,1], index: 2, kind: output, shape index: {}]  }
   0x1   :  { %v3_v0 = vld [vmem:[%s56_s0] sm:$0x1]  ;;  %v20_v2 = vld [vmem:[%s56_s0 + $0x1] sm:$0x1] }
   0x2   :  { %v4_v1 = vld [vmem:[%s57_s1] sm:$0x1]  ;;  %v21_v4 = vld [vmem:[%s57_s1 + $0x1] sm:$0x1] }
   0x3   :  { %v7_v3 = vmul.f32 %v4_v1, %v3_v0  ;;  %v16_v5 = vmul.f32 %v21_v4, %v20_v2 }
   0x5   :  { %9 = vst [vmem:[%s58_s2] sm:$0x1] %v7_v3 }
   0x6   :  { %22 = vst [vmem:[%s58_s2 + $0x1] sm:$0x1] %v16_v5 }

</bundles_post_ra>
